<compile_context>
chip_gen: v7x
topology: tpu7x:2x2x1
jax: 0.10.0
libtpu: 0.0.40
codegen_flags: <defaults>
</compile_context>

<pallas_src>
import functools

import jax
import jax.numpy as jnp
from jax.experimental import pallas as pl
from jax.experimental.pallas import tpu as pltpu


def _round_up(x, m):
    return ((x + m - 1) // m) * m


def _cdiv(a, b):
    return (a + b - 1) // b


def _pick_tile(dim, target, align):
    """Full extent if it already fits the target, else an `align`-multiple that splits
    `dim` into (nearly) even pieces — avoids any wrapper-side operand padding."""
    if dim <= target:
        return dim
    steps = _cdiv(dim, target)
    return min(_round_up(_cdiv(dim, steps), align), _round_up(dim, align))


# --------------------------------------------------------------------------------------
# Kernel bodies
# --------------------------------------------------------------------------------------

def _load_operands(x_ref, w_ref, *, w_transposed, k_rem):
    """Load the x / W tiles, zero the ragged K tail (if any) and cast x to the W dtype."""
    x = x_ref[...]
    w = w_ref[...]
    if k_rem:  # static: only a ragged K pays for the mask (garbage tail would corrupt acc)
        k = pl.program_id(2)
        limit = jnp.where(k == pl.num_programs(2) - 1, k_rem, x.shape[-1])
        xk = jax.lax.broadcasted_iota(jnp.int32, x.shape, 1)
        x = jnp.where(xk < limit, x, jnp.zeros_like(x))
        wk = jax.lax.broadcasted_iota(jnp.int32, w.shape, 0 if w_transposed else 1)
        w = jnp.where(wk < limit, w, jnp.zeros_like(w))
    if x.dtype != w.dtype:
        # bf16 (or fp8) weight stored in HBM: cast the activation tile on the VPU in VMEM.
        x = x.astype(w.dtype)
    return x, w


def _tile_matmul(x, w, w_transposed):
    if w_transposed:              # w tile is (tk, tn) — weight stored (IN, OUT)
        return jnp.dot(x, w, preferred_element_type=jnp.float32)
    # torch nn.Linear layout: w tile is (tn, tk); NT matmul contracts K without HBM transpose
    return jnp.dot(x, w.T, preferred_element_type=jnp.float32)


def _singlek_kernel(x_ref, w_ref, push_ref, o_ref, *, w_transposed):
    """K fits in a single tile: no accumulator scratch, fused epilogue."""
    x, w = _load_operands(x_ref, w_ref, w_transposed=w_transposed, k_rem=0)
    o_ref[...] = (_tile_matmul(x, w, w_transposed) * push_ref[...]).astype(o_ref.dtype)


def _multik_f32out_kernel(x_ref, w_ref, push_ref, o_ref, *, w_transposed, k_rem):
    """f32 output: accumulate directly in the K-resident output block (no scratch)."""
    k = pl.program_id(2)

    @pl.when(k == 0)
    def _init():
        o_ref[...] = jnp.zeros_like(o_ref)

    x, w = _load_operands(x_ref, w_ref, w_transposed=w_transposed, k_rem=k_rem)
    o_ref[...] += _tile_matmul(x, w, w_transposed)

    @pl.when(k == pl.num_programs(2) - 1)
    def _finalize():
        o_ref[...] = o_ref[...] * push_ref[...]


def _multik_acc_kernel(x_ref, w_ref, push_ref, o_ref, acc_ref, *, w_transposed, k_rem):
    """Non-f32 output: f32 VMEM accumulator; epilogue + downcast only at k == last."""
    k = pl.program_id(2)

    @pl.when(k == 0)
    def _init():
        acc_ref[...] = jnp.zeros_like(acc_ref)

    x, w = _load_operands(x_ref, w_ref, w_transposed=w_transposed, k_rem=k_rem)
    acc_ref[...] += _tile_matmul(x, w, w_transposed)

    @pl.when(k == pl.num_programs(2) - 1)
    def _finalize():
        o_ref[...] = (acc_ref[...] * push_ref[...]).astype(o_ref.dtype)


# --------------------------------------------------------------------------------------
# Wrapper
# --------------------------------------------------------------------------------------

def propulsion_linear(x, weight, propulsion, *, degree=15, weight_is_transposed=False,
                      tm=512, tn=1024, tk=512, w_buffers=2, split_for_two_cores=True):
    """PropulsionLinear forward: (x @ W^T) * propulsion**degree.

    x:          (M, K)
    weight:     (N, K) torch nn.Linear layout, or (K, N) if weight_is_transposed=True.
                Store it in bf16 (v5e/v6e/v7x) to run the MXU at its fast rate; x tiles
                are cast in-kernel and accumulation / the epilogue stay f32.
    propulsion: (N,)
    w_buffers:  set 3 if an xprof trace shows exposed DMA waits on the weight stream.
    Note: propulsion**degree (degree=15) in f32 can over/underflow for |p| far from 1,
    matching the PyTorch reference semantics.
    """
    out_dtype = x.dtype
    M, K = x.shape
    if weight_is_transposed:
        Kw, N = weight.shape
    else:
        N, Kw = weight.shape
    assert Kw == K, f"weight K dim {Kw} != x K dim {K}"

    # Hoisted epilogue: tiny (N,) op computed once per call, never per grid step.
    push = (propulsion.astype(jnp.float32) ** degree).reshape(1, N)

    x_bytes = jnp.dtype(x.dtype).itemsize
    w_bytes = jnp.dtype(weight.dtype).itemsize
    o_bytes = jnp.dtype(out_dtype).itemsize

    # Tile selection: full dim if it fits, else evenly split (no padding of any operand).
    sub = 8 * max(1, 4 // x_bytes)                 # sublane granularity for x / out rows
    tm = _pick_tile(M, tm, sub)
    tn = _pick_tile(N, tn, 256)                    # 256-lane aligned for v6e/v7x MXU cols
    tk = _pick_tile(K, tk, 128)

    grid_m, grid_n = _cdiv(M, tm), _cdiv(N, tn)
    # v7x has 2 TensorCores: make sure at least one "parallel" axis has >= 2 tiles.
    if split_for_two_cores and grid_m == 1 and grid_n == 1:
        if N >= 2 * 128:
            tn = _round_up(_cdiv(N, 2), 128)
            grid_n = _cdiv(N, tn)
        elif M >= 2 * sub:
            tm = _round_up(_cdiv(M, 2), sub)
            grid_m = _cdiv(M, tm)
    grid_k = _cdiv(K, tk)
    k_rem = K % tk                                  # 0 => no in-kernel K-tail masking

    # Weight BlockSpec (layout-dependent); optional triple buffering of the biggest DMA.
    w_spec_kwargs = {}
    if w_buffers and w_buffers != 2:
        w_spec_kwargs["pipeline_mode"] = pl.Buffered(w_buffers)
    w_nbuf = w_buffers if w_buffers else 2

    use_scratch_acc = (grid_k > 1) and (out_dtype != jnp.float32)

    # vmem limit from the actual buffer math (×2 headroom), capped for v7x's 64 MiB VMEM.
    vmem_bytes = (2 * tm * tk * x_bytes
                  + w_nbuf * tk * tn * w_bytes
                  + 2 * tn * 4
                  + 2 * tm * tn * o_bytes
                  + (tm * tn * 4 if use_scratch_acc else 0))
    vmem_limit = int(min(max(2 * vmem_bytes, 32 << 20), 64 << 20))

    if grid_k == 1:
        grid = (grid_m, grid_n)
        dims = ("parallel", "parallel")
        kernel = functools.partial(_singlek_kernel, w_transposed=weight_is_transposed)
        scratch = ()
        x_spec = pl.BlockSpec((tm, tk), lambda i, j: (i, 0))
        if weight_is_transposed:
            w_spec = pl.BlockSpec((tk, tn), lambda i, j: (0, j), **w_spec_kwargs)
        else:
            w_spec = pl.BlockSpec((tn, tk), lambda i, j: (j, 0), **w_spec_kwargs)
        p_spec = pl.BlockSpec((1, tn), lambda i, j: (0, j))
        o_spec = pl.BlockSpec((tm, tn), lambda i, j: (i, j))
    else:
        grid = (grid_m, grid_n, grid_k)
        dims = ("parallel", "parallel", "arbitrary")
        x_spec = pl.BlockSpec((tm, tk), lambda i, j, k: (i, k))
        if weight_is_transposed:
            w_spec = pl.BlockSpec((tk, tn), lambda i, j, k: (k, j), **w_spec_kwargs)
        else:
            w_spec = pl.BlockSpec((tn, tk), lambda i, j, k: (j, k), **w_spec_kwargs)
        p_spec = pl.BlockSpec((1, tn), lambda i, j, k: (0, j))
        o_spec = pl.BlockSpec((tm, tn), lambda i, j, k: (i, j))
        if use_scratch_acc:
            kernel = functools.partial(_multik_acc_kernel,
                                       w_transposed=weight_is_transposed, k_rem=k_rem)
            scratch = [pltpu.VMEM((tm, tn), jnp.float32)]
        else:
            kernel = functools.partial(_multik_f32out_kernel,
                                       w_transposed=weight_is_transposed, k_rem=k_rem)
            scratch = ()

    return pl.pallas_call(
        kernel,
        out_shape=jax.ShapeDtypeStruct((M, N), out_dtype),
        grid_spec=pltpu.PrefetchScalarGridSpec(
            num_scalar_prefetch=0,
            grid=grid,
            in_specs=[x_spec, w_spec, p_spec],
            out_specs=o_spec,
            scratch_shapes=scratch,
        ),
        compiler_params=pltpu.CompilerParams(
            dimension_semantics=dims,
            vmem_limit_bytes=vmem_limit,
        ),
        cost_estimate=pl.CostEstimate(
            flops=2 * M * N * K,
            transcendentals=0,
            bytes_accessed=int(M * K * x_bytes + K * N * w_bytes + N * 4 + M * N * o_bytes),
        ),
    )(x, weight, push)


if __name__ == "__main__":
    key = jax.random.PRNGKey(0)
    kx, kw, kp, kx2, kw2, kp2, kx3 = jax.random.split(key, 7)

    fwd = jax.jit(propulsion_linear,
                  static_argnames=("degree", "weight_is_transposed", "tm", "tn", "tk",
                                   "w_buffers", "split_for_two_cores"))

    # --- 1. Module-default small shapes, torch (OUT, IN) weight layout, f32 ------------
    batch, in_features, out_features, degree = 8, 32, 64, 15
    x = jax.random.normal(kx, (batch, in_features), dtype=jnp.float32)
    bound = 1.0 / (in_features ** 0.5)
    weight = jax.random.uniform(kw, (out_features, in_features),
                                minval=-bound, maxval=bound, dtype=jnp.float32)
    propulsion = 1.0 + 0.05 * jax.random.normal(kp, (out_features,), dtype=jnp.float32)
    push = propulsion ** degree

    out = jax.block_until_ready(fwd(x, weight, propulsion, degree=degree))
    ref = (x @ weight.T) * push
    assert out.shape == (batch, out_features)
    assert jnp.allclose(out, ref, atol=1e-4, rtol=1e-4)

    # --- 2. bf16 weight stored pre-transposed (IN, OUT): x cast per-tile in-kernel -----
    weight_t_bf16 = jnp.asarray(weight.T, dtype=jnp.bfloat16)
    out_bf = jax.block_until_ready(
        fwd(x, weight_t_bf16, propulsion, degree=degree, weight_is_transposed=True))
    ref_bf = jnp.dot(x.astype(jnp.bfloat16), weight_t_bf16,
                     preferred_element_type=jnp.float32) * push
    assert jnp.allclose(out_bf, ref_bf, atol=2e-2, rtol=2e-2)

    # --- 3. Larger f32 problem: multi-K grid with ragged K tail, >=2 parallel N tiles --
    M2, K2, N2 = 384, 640, 640
    x2 = jax.random.normal(kx2, (M2, K2), dtype=jnp.float32)
    b2 = 1.0 / (K2 ** 0.5)
    w2_t = jax.random.uniform(kw2, (K2, N2), minval=-b2, maxval=b2, dtype=jnp.float32)
    prop2 = 1.0 + 0.05 * jax.random.normal(kp2, (N2,), dtype=jnp.float32)
    out2 = jax.block_until_ready(
        fwd(x2, w2_t, prop2, degree=degree, weight_is_transposed=True))
    ref2 = (x2 @ w2_t) * (prop2 ** degree)
    assert out2.shape == (M2, N2)
    assert jnp.allclose(out2, ref2, atol=5e-3, rtol=5e-3)

    # --- 4. bf16 activations + bf16 torch-layout (OUT, IN) weight: acc-scratch path ----
    x3 = jax.random.normal(kx3, (M2, K2), dtype=jnp.bfloat16)
    w3 = jnp.asarray(w2_t.T, dtype=jnp.bfloat16)            # (N, K) torch layout
    out3 = jax.block_until_ready(fwd(x3, w3, prop2, degree=degree))
    ref3 = jnp.dot(x3, w3.T, preferred_element_type=jnp.float32) * (prop2 ** degree)
    assert out3.shape == (M2, N2)
    assert jnp.allclose(out3.astype(jnp.float32), ref3, atol=1e-2, rtol=1e-2)

    print("KERNEL_OK")
</pallas_src>

<mosaic_0001>
module attributes {stable_mosaic.version = 11 : i64} {
  func.func @_singlek_kernel(%arg0: i32, %arg1: i32, %arg2: memref<8x32xf32, #tpu.memory_space<vmem>>, %arg3: memref<64x32xf32, #tpu.memory_space<vmem>>, %arg4: memref<1x64xf32, #tpu.memory_space<vmem>>, %arg5: memref<8x64xf32, #tpu.memory_space<vmem>>) attributes {dimension_semantics = [#tpu.dimension_semantics<parallel>, #tpu.dimension_semantics<parallel>], iteration_bounds = array<i64: 1, 1>, scalar_prefetch = 0 : i64, scratch_operands = 0 : i64, tpu.core_type = #tpu.core_type<tc>, window_params = [{transform_indices = @transform_0, window_bounds = array<i64: 8, 32>}, {transform_indices = @transform_1, window_bounds = array<i64: 64, 32>}, {transform_indices = @transform_2, window_bounds = array<i64: 1, 64>}, {transform_indices = @transform_3, window_bounds = array<i64: 8, 64>}]} {
    %c0 = arith.constant 0 : index
    %c0_0 = arith.constant 0 : index
    %0 = vector.load %arg2[%c0, %c0_0] : memref<8x32xf32, #tpu.memory_space<vmem>>, vector<8x32xf32>
    %c0_1 = arith.constant 0 : index
    %c0_2 = arith.constant 0 : index
    %1 = vector.load %arg3[%c0_1, %c0_2] : memref<64x32xf32, #tpu.memory_space<vmem>>, vector<64x32xf32>
    %2 = tpu.transpose %1, [1, 0] : vector<64x32xf32> -> vector<32x64xf32>
    %cst = arith.constant dense<0.000000e+00> : vector<8x64xf32>
    %3 = tpu.matmul %0, %2, %cst {dimension_numbers = #tpu.dot_dimension_numbers<[1], [0], [0], [1], [0, 0, 1, 1], [], []>} : vector<8x32xf32>, vector<32x64xf32>, vector<8x64xf32> -> vector<8x64xf32>
    %c0_3 = arith.constant 0 : index
    %c0_4 = arith.constant 0 : index
    %4 = vector.load %arg4[%c0_3, %c0_4] : memref<1x64xf32, #tpu.memory_space<vmem>>, vector<1x64xf32>
    %5 = vector.broadcast %4 : vector<1x64xf32> to vector<8x64xf32>
    %6 = arith.mulf %3, %5 : vector<8x64xf32>
    %c0_5 = arith.constant 0 : index
    %c0_6 = arith.constant 0 : index
    %7 = vector.load %arg5[%c0_5, %c0_6] : memref<8x64xf32, #tpu.memory_space<vmem>>, vector<8x64xf32>
    tpu.vector_store %arg5[%c0_5, %c0_6], %6 {strides = array<i32>} : memref<8x64xf32, #tpu.memory_space<vmem>>, vector<8x64xf32>,
    return
  }
  func.func @transform_0(%arg0: i32, %arg1: i32) -> (i32, i32) {
    %c0_i32 = arith.constant 0 : i32
    %c0_i32_0 = arith.constant 0 : i32
    return %arg0, %c0_i32 : i32, i32
  }
  func.func @transform_1(%arg0: i32, %arg1: i32) -> (i32, i32) {
    %c0_i32 = arith.constant 0 : i32
    %c0_i32_0 = arith.constant 0 : i32
    return %arg1, %c0_i32 : i32, i32
  }
  func.func @transform_2(%arg0: i32, %arg1: i32) -> (i32, i32) {
    %c0_i32 = arith.constant 0 : i32
    %c0_i32_0 = arith.constant 0 : i32
    return %c0_i32, %arg1 : i32, i32
  }
  func.func @transform_3(%arg0: i32, %arg1: i32) -> (i32, i32) {
    %c0_i32 = arith.constant 0 : i32
    return %arg0, %arg1 : i32, i32
  }
}

</mosaic_0001>

<bundles_post_ra>
// kernel: propulsion_linear.1
= control target key start
LH: loop header
LB: loop body
LE: loop exit
PB: predicated region body
PF: predicated region fallthrough
CT: control target
= control target key end

     0   :  { %vm24_vm0 = vcmask 261120   ;;  %v228_v2 = vmov 0.0|0.0   ;;  %vm229_vm2 = vmmov 0   ;;  %v230_v5 = vmov 0.0   ;;  %s309_s0 = inlined_call_operand.vmem [shape: f32[8,32], index: 0, kind: input, shape index: {}]   ;;  %s310_s1 = inlined_call_operand.vmem [shape: f32[64,32], index: 1, kind: input, shape index: {}]   ;;  %s311_s2 = inlined_call_operand.vmem [shape: f32[1,64], index: 2, kind: input, shape index: {}]   ;;  %s312_s3 = inlined_call_operand.hbm [shape: f32[8,64], index: 3, kind: output, shape index: {}]  }
   0x1   :  { %v16_v0 = vld [vmem:[%s310_s1] sm:$0xff]  ;;  %v17_v1 = vld [vmem:[%s310_s1 + $0x8] sm:$0xff]  ;;  %184 = vmatprep.subr.bf16.mxu0 %v228_v2  ;;  %vm260_vm1 = vmpackc.low %vm24_vm0, %vm24_vm0  ;;  %181 = vmatprep.mubr.msk.f32.mxu0 %vm229_vm2, %v230_v5 }
   0x2   :  { %v185_v3 = vpack.c.bf16 %v17_v1, %v16_v0 }
   0x4   :  { %187 = vmatpush3.bf16.xpose.msk.msra.mxu0 %vm260_vm1, %v185_v3 }
   0x5   :  { %8 = vsyncpa [#allocation3], 0  ;;  %188 = vmatprep.subr.bf16.mxu0 %v228_v2  ;;  %v18_v6 = vld [vmem:[%s310_s1 + $0x10] sm:$0xff]  ;;  %v19_v7 = vld [vmem:[%s310_s1 + $0x18] sm:$0xff]  ;;  %s231_s5 = smov [#allocation2]   ;;  %vm130_vm3 = vcmask 523264  }
   0x6   :  { %v189_v8 = vpack.c.bf16 %v19_v7, %v18_v6  ;;  %v20_v9 = vld [vmem:[%s310_s1 + $0x20] sm:$0xff]  ;;  %v21_v10 = vld [vmem:[%s310_s1 + $0x28] sm:$0xff]  ;;  %v22_v12 = vld [vmem:[%s310_s1 + $0x30] sm:$0xff]  ;;  %s138_s6 = sshll.u32 %s231_s5, 4  ;;  %s139_s6 = int_to_ptr.vmem [resolvable:$true] %s138_s6 }
   0x7   :  { %v193_v11 = vpack.c.bf16 %v21_v10, %v20_v9  ;;  %v23_v13 = vld [vmem:[%s310_s1 + $0x38] sm:$0xff]  ;;  %v15_v15 = vld [vmem:[%s309_s0] sm:$0xff]  ;;  %s204_s1 = scalar_lea.vmem %s139_s6, 128  ;;  %p209_p1 = scmp.lt.s32.totalorder %s139_s6, %s139_s6 }
   0x8   :  { %v197_v14 = vpack.c.bf16 %v23_v13, %v22_v12  ;;  %v155_v16 = vld [vmem:[%s311_s2] ss:$0 sm:$0xff]  ;;  %p205_p0 = scmp.ne.s32.totalorder %s139_s6, %s204_s1  ;;  %p210_p2 = scmp.lt.s32.totalorder %s204_s1, %s204_s1 }
   0xa   :  { %p211_p3 = por %p210_p2, %p209_p1 }
   0xc   :  { %191 = vmatpush3.bf16.xpose.msk.msra.mxu0 %vm260_vm1, %v189_v8  ;;  %p212_p4 = pnand %p211_p3, %p205_p0 }
   0xd   :  { %192 = vmatprep.subr.bf16.mxu0 %v228_v2 }
  0x14   :  { %195 = vmatpush3.bf16.xpose.msk.msra.mxu0 %vm260_vm1, %v193_v11 }
  0x15   :  { %196 = vmatprep.subr.bf16.mxu0 %v228_v2 }
  0x1c   :  { %199 = vmatpush3.bf16.xpose.msk.msra.mxu0 %vm260_vm1, %v197_v14 }
  0x23   :  { %182 = vmatmul.mubr.msk.f32.vlgmr.msra.gmra.mrb[0].mxu0 %vm24_vm0, %v15_v15 }
  0xf6   :  { %v118_v17 = vpop.f32.mrb[0].mxu0 }
  0xf7   :  { %v129_v18 = vmul.f32 %v155_v16, %v118_v17  ;;  %v183_v19 = vpop.f32.mrb[1].mxu0 }
  0xf9   :  { %131 = vst.msk [vmem:[#allocation2] sm:$0xff] %vm130_vm3, %v129_v18 }
  0xfa   :  { %215 = shalt.err (!%p212_p4)
}
  0xfb   :  { %s216_s8 = scalar_lea.hbm %s312_s3, 128 }
  0xfc   :  { %p217_p5 = scmp.ne.s32.totalorder %s312_s3, %s216_s8  ;;  %p220_p6 = scmp.lt.u32.totalorder %s216_s8, %s312_s3 }
  0xfe   :  { %p222_p7 = pnand %p220_p6, %p217_p5 }
 0x100   :  { %225 = shalt.err (!%p222_p7)
}
 0x101   :  { %141 = dma.vmem_to_hbm [thread:$0]  %s139_s6, 128, %s312_s3, [#allocation3]  }
 0x102   :  { %226 = dma.done.wait [#allocation3], 128  }
 0x103   :  { %227 = vsyncadd [#allocation3], 4294967168 }
 0x104   :  { %145 = vsyncpa [#allocation3], 1 }

</bundles_post_ra>
